<compile_context>
chip_gen: v5e
topology: v5e:2x2
jax: 0.10.0
libtpu: 0.0.40
codegen_flags: <defaults>
</compile_context>

<pallas_src>
import jax
import jax.numpy as jnp
from jax.experimental import pallas as pl
from jax.experimental.pallas import tpu as pltpu

IN_PAD = 8      # 3 (state) + 1 (action), zero-padded to a full sublane group
H1 = 128        # fused fc_s/fc_a output width (64 + 64)
H2 = 32         # fc_q output width
_TB_MAX = 512   # batch tile (lane axis); multiple of 128


def qnet_kernel(xa_ref, wh_ref, bh_ref, wq_ref, bq_ref, wo_ref, bo_ref, out_ref):
    # h = relu(Wh @ [x; a] + bh)   -- fused fc_s + fc_a (block-diagonal Wh)
    h = jnp.maximum(
        jnp.dot(wh_ref[...], xa_ref[...], preferred_element_type=jnp.float32)
        + bh_ref[...], 0.0)                                        # [128, TB]
    # q = relu(Wq @ h + bq)        -- fc_q with the original unsplit weight
    q = jnp.maximum(
        jnp.dot(wq_ref[...], h, preferred_element_type=jnp.float32)
        + bq_ref[...], 0.0)                                        # [32, TB]
    # out = Wo @ q + bo            -- fc_out: K=32, N=1 -> VPU mul + XLU reduce
    out_ref[...] = (jnp.sum(q * wo_ref[...], axis=0, keepdims=True)
                    + bo_ref[0])                                   # [1, TB]


def _round_up(x, m):
    return (x + m - 1) // m * m


@jax.jit
def qnet_forward(x, a, params):
    B = x.shape[0]
    TB = min(_TB_MAX, _round_up(B, 128))
    B_pad = _round_up(B, TB)

    # Fused, transposed, lane-dense input: [IN_PAD, B_pad] (batch on lanes).
    xa = jnp.concatenate([x, a], axis=1)                           # [B, 4]
    xa = jnp.pad(xa, ((0, B_pad - B), (0, IN_PAD - xa.shape[1])))  # [B_pad, 8]
    xa_t = xa.T                                                    # [8, B_pad]

    out_t = pl.pallas_call(
        qnet_kernel,
        out_shape=jax.ShapeDtypeStruct((1, B_pad), jnp.float32),
        grid=(B_pad // TB,),
        in_specs=[
            # activations: streamed over the batch grid
            pl.BlockSpec((IN_PAD, TB), lambda i: (0, i)),
            # weights / biases: constant index_map -> VMEM resident
            pl.BlockSpec((H1, IN_PAD), lambda i: (0, 0)),
            pl.BlockSpec((H1, 1), lambda i: (0, 0)),
            pl.BlockSpec((H2, H1), lambda i: (0, 0)),
            pl.BlockSpec((H2, 1), lambda i: (0, 0)),
            pl.BlockSpec((H2, 1), lambda i: (0, 0)),
            # scalar output bias in SMEM
            pl.BlockSpec(memory_space=pltpu.MemorySpace.SMEM),
        ],
        out_specs=pl.BlockSpec((1, TB), lambda i: (0, i)),
        compiler_params=pltpu.CompilerParams(
            dimension_semantics=("parallel",)),
    )(xa_t, params["wh"], params["bh"], params["wq"], params["bq"],
      params["wo"], params["bo"])

    return out_t[:, :B].T                                          # [B, 1]


def init_params(key):
    """PyTorch-default Linear init: U(-1/sqrt(fan_in), +1/sqrt(fan_in))."""
    def linear(k, fan_in, fan_out):
        kw, kb = jax.random.split(k)
        bound = 1.0 / jnp.sqrt(jnp.float32(fan_in))
        w = jax.random.uniform(kw, (fan_out, fan_in), jnp.float32, -bound, bound)
        b = jax.random.uniform(kb, (fan_out,), jnp.float32, -bound, bound)
        return w, b

    k1, k2, k3, k4 = jax.random.split(key, 4)
    ws, bs = linear(k1, 3, 64)      # fc_s  : 3   -> 64
    wa, ba = linear(k2, 1, 64)      # fc_a  : 1   -> 64
    wq, bq = linear(k3, 128, 32)    # fc_q  : 128 -> 32
    wo, bo = linear(k4, 32, 1)      # fc_out: 32  -> 1

    # Block-diagonal fused first layer: rows 0:64 read the state (cols 0:3),
    # rows 64:128 read the action (col 3); cols 4:8 are zero padding.
    wh = jnp.zeros((H1, IN_PAD), jnp.float32)
    wh = wh.at[:64, :3].set(ws)
    wh = wh.at[64:, 3:4].set(wa)
    bh = jnp.concatenate([bs, ba]).reshape(H1, 1)

    return {
        # kernel layout (transposed: batch on lanes)
        "wh": wh, "bh": bh,
        "wq": wq, "bq": bq.reshape(H2, 1),
        "wo": wo.T,                 # [32, 1]
        "bo": bo,                   # (1,) scalar -> SMEM
        # raw torch-layout weights for the pure-JAX reference
        "raw": dict(ws=ws, bs=bs, wa=wa, ba=ba, wq=wq, bq=bq, wo=wo, bo=bo),
    }


def qnet_reference(x, a, params):
    """Pure-JAX mirror of QNet.forward (h1/h2 -> cat -> fc_q -> fc_out)."""
    r = params["raw"]
    h1 = jnp.maximum(x @ r["ws"].T + r["bs"], 0.0)
    h2 = jnp.maximum(a @ r["wa"].T + r["ba"], 0.0)
    cat = jnp.concatenate([h1, h2], axis=1)
    q = jnp.maximum(cat @ r["wq"].T + r["bq"], 0.0)
    # fc_out (32 -> 1) written as mul + reduce; identical to q @ wo.T + bo.
    return jnp.sum(q * r["wo"], axis=1, keepdims=True) + r["bo"]


if __name__ == "__main__":
    key = jax.random.PRNGKey(0)
    kp, kx, ka = jax.random.split(key, 3)

    params = init_params(kp)

    # Small shapes implied by the module: state [B, 3], action [B, 1].
    B = 8
    x = jax.random.normal(kx, (B, 3), jnp.float32)
    a = jax.random.normal(ka, (B, 1), jnp.float32)

    out = jax.block_until_ready(qnet_forward(x, a, params))
    ref = qnet_reference(x, a, params)
    assert out.shape == (B, 1)
    assert jnp.allclose(out, ref, atol=1e-4, rtol=1e-4), \
        float(jnp.max(jnp.abs(out - ref)))

    # Also exercise the multi-tile batch grid (2 tiles of 512) + padding path.
    B2 = 1000
    kx2, ka2 = jax.random.split(kx)
    x2 = jax.random.normal(kx2, (B2, 3), jnp.float32)
    a2 = jax.random.normal(ka2, (B2, 1), jnp.float32)
    out2 = jax.block_until_ready(qnet_forward(x2, a2, params))
    ref2 = qnet_reference(x2, a2, params)
    assert out2.shape == (B2, 1)
    assert jnp.allclose(out2, ref2, atol=1e-4, rtol=1e-4), \
        float(jnp.max(jnp.abs(out2 - ref2)))

    print("KERNEL_OK")
</pallas_src>

<mosaic_0001>
module attributes {stable_mosaic.version = 11 : i64} {
  func.func @qnet_kernel(%arg0: i32, %arg1: memref<8x128xf32, #tpu.memory_space<vmem>>, %arg2: memref<128x8xf32, #tpu.memory_space<vmem>>, %arg3: memref<128x1xf32, #tpu.memory_space<vmem>>, %arg4: memref<32x128xf32, #tpu.memory_space<vmem>>, %arg5: memref<32x1xf32, #tpu.memory_space<vmem>>, %arg6: memref<32x1xf32, #tpu.memory_space<vmem>>, %arg7: memref<1xf32, #tpu.memory_space<smem>>, %arg8: memref<1x128xf32, #tpu.memory_space<vmem>>) attributes {dimension_semantics = [#tpu.dimension_semantics<parallel>], iteration_bounds = array<i64: 1>, scalar_prefetch = 0 : i64, scratch_operands = 0 : i64, tpu.core_type = #tpu.core_type<tc>, window_params = [{transform_indices = @transform_0, window_bounds = array<i64: 8, 128>}, {pipeline_mode = #tpu.pipeline_mode<synchronous>, transform_indices = @transform_1, window_bounds = array<i64: 128, 8>}, {pipeline_mode = #tpu.pipeline_mode<synchronous>, transform_indices = @transform_2, window_bounds = array<i64: 128, 1>}, {pipeline_mode = #tpu.pipeline_mode<synchronous>, transform_indices = @transform_3, window_bounds = array<i64: 32, 128>}, {pipeline_mode = #tpu.pipeline_mode<synchronous>, transform_indices = @transform_4, window_bounds = array<i64: 32, 1>}, {pipeline_mode = #tpu.pipeline_mode<synchronous>, transform_indices = @transform_5, window_bounds = array<i64: 32, 1>}, {transform_indices = @transform_6, window_bounds = array<i64: 1>}, {transform_indices = @transform_7, window_bounds = array<i64: 1, 128>}]} {
    %c0 = arith.constant 0 : index
    %c0_0 = arith.constant 0 : index
    %0 = vector.load %arg2[%c0, %c0_0] : memref<128x8xf32, #tpu.memory_space<vmem>>, vector<128x8xf32>
    %c0_1 = arith.constant 0 : index
    %c0_2 = arith.constant 0 : index
    %1 = vector.load %arg1[%c0_1, %c0_2] : memref<8x128xf32, #tpu.memory_space<vmem>>, vector<8x128xf32>
    %cst = arith.constant dense<0.000000e+00> : vector<128x128xf32>
    %2 = tpu.matmul %0, %1, %cst {dimension_numbers = #tpu.dot_dimension_numbers<[1], [0], [0], [1], [0, 0, 1, 1], [], []>} : vector<128x8xf32>, vector<8x128xf32>, vector<128x128xf32> -> vector<128x128xf32>
    %c0_3 = arith.constant 0 : index
    %c0_4 = arith.constant 0 : index
    %3 = vector.load %arg3[%c0_3, %c0_4] : memref<128x1xf32, #tpu.memory_space<vmem>>, vector<128x1xf32>
    %4 = vector.broadcast %3 : vector<128x1xf32> to vector<128x128xf32>
    %5 = arith.addf %2, %4 : vector<128x128xf32>
    %cst_5 = arith.constant 0.000000e+00 : f32
    %6 = vector.broadcast %cst_5 : f32 to vector<128x128xf32>
    %7 = arith.maximumf %5, %6 : vector<128x128xf32>
    %c0_6 = arith.constant 0 : index
    %c0_7 = arith.constant 0 : index
    %8 = vector.load %arg4[%c0_6, %c0_7] : memref<32x128xf32, #tpu.memory_space<vmem>>, vector<32x128xf32>
    %cst_8 = arith.constant dense<0.000000e+00> : vector<32x128xf32>
    %9 = tpu.matmul %8, %7, %cst_8 {dimension_numbers = #tpu.dot_dimension_numbers<[1], [0], [0], [1], [0, 0, 1, 1], [], []>} : vector<32x128xf32>, vector<128x128xf32>, vector<32x128xf32> -> vector<32x128xf32>
    %c0_9 = arith.constant 0 : index
    %c0_10 = arith.constant 0 : index
    %10 = vector.load %arg5[%c0_9, %c0_10] : memref<32x1xf32, #tpu.memory_space<vmem>>, vector<32x1xf32>
    %11 = vector.broadcast %10 : vector<32x1xf32> to vector<32x128xf32>
    %12 = arith.addf %9, %11 : vector<32x128xf32>
    %cst_11 = arith.constant 0.000000e+00 : f32
    %13 = vector.broadcast %cst_11 : f32 to vector<32x128xf32>
    %14 = arith.maximumf %12, %13 : vector<32x128xf32>
    %c0_12 = arith.constant 0 : index
    %c0_13 = arith.constant 0 : index
    %15 = vector.load %arg6[%c0_12, %c0_13] : memref<32x1xf32, #tpu.memory_space<vmem>>, vector<32x1xf32>
    %16 = vector.broadcast %15 : vector<32x1xf32> to vector<32x128xf32>
    %17 = arith.mulf %14, %16 : vector<32x128xf32>
    %cst_14 = arith.constant dense<0.000000e+00> : vector<128xf32>
    %18 = vector.multi_reduction <add>, %17, %cst_14 [0] : vector<32x128xf32> to vector<128xf32>
    %19 = vector.shape_cast %18 : vector<128xf32> to vector<1x128xf32>
    %c0_15 = arith.constant 0 : index
    %20 = memref.load %arg7[%c0_15] : memref<1xf32, #tpu.memory_space<smem>>
    %21 = vector.broadcast %20 : f32 to vector<1x128xf32>
    %22 = arith.addf %19, %21 : vector<1x128xf32>
    %c0_16 = arith.constant 0 : index
    %c0_17 = arith.constant 0 : index
    %23 = vector.load %arg8[%c0_16, %c0_17] : memref<1x128xf32, #tpu.memory_space<vmem>>, vector<1x128xf32>
    tpu.vector_store %arg8[%c0_16, %c0_17], %22 {strides = array<i32>} : memref<1x128xf32, #tpu.memory_space<vmem>>, vector<1x128xf32>,
    return
  }
  func.func @transform_0(%arg0: i32) -> (i32, i32) {
    %c0_i32 = arith.constant 0 : i32
    %c0_i32_0 = arith.constant 0 : i32
    return %c0_i32, %arg0 : i32, i32
  }
  func.func @transform_1(%arg0: i32) -> (i32, i32) {
    %c0_i32 = arith.constant 0 : i32
    %c0_i32_0 = arith.constant 0 : i32
    %c0_i32_1 = arith.constant 0 : i32
    return %c0_i32, %c0_i32_0 : i32, i32
  }
  func.func @transform_2(%arg0: i32) -> (i32, i32) {
    %c0_i32 = arith.constant 0 : i32
    %c0_i32_0 = arith.constant 0 : i32
    %c0_i32_1 = arith.constant 0 : i32
    return %c0_i32, %c0_i32_0 : i32, i32
  }
  func.func @transform_3(%arg0: i32) -> (i32, i32) {
    %c0_i32 = arith.constant 0 : i32
    %c0_i32_0 = arith.constant 0 : i32
    %c0_i32_1 = arith.constant 0 : i32
    return %c0_i32, %c0_i32_0 : i32, i32
  }
  func.func @transform_4(%arg0: i32) -> (i32, i32) {
    %c0_i32 = arith.constant 0 : i32
    %c0_i32_0 = arith.constant 0 : i32
    %c0_i32_1 = arith.constant 0 : i32
    return %c0_i32, %c0_i32_0 : i32, i32
  }
  func.func @transform_5(%arg0: i32) -> (i32, i32) {
    %c0_i32 = arith.constant 0 : i32
    %c0_i32_0 = arith.constant 0 : i32
    %c0_i32_1 = arith.constant 0 : i32
    return %c0_i32, %c0_i32_0 : i32, i32
  }
  func.func @transform_6(%arg0: i32) -> i32 {
    %c0_i32 = arith.constant 0 : i32
    %c0_i32_0 = arith.constant 0 : i32
    return %c0_i32 : i32
  }
  func.func @transform_7(%arg0: i32) -> (i32, i32) {
    %c0_i32 = arith.constant 0 : i32
    %c0_i32_0 = arith.constant 0 : i32
    return %c0_i32, %arg0 : i32, i32
  }
}

</mosaic_0001>

<bundles_post_ra>
// kernel: qnet_forward.1
= control target key start
LH: loop header
LB: loop body
LE: loop exit
PB: predicated region body
PF: predicated region fallthrough
CT: control target
= control target key end

     0   :  { %v414_v0 = vmov 0   ;;  %vm140_vm0 = vcmask 64512   ;;  %s618_s2 = inlined_call_operand.vmem [shape: f32[128,1], index: 2, kind: input, shape index: {}]   ;;  %s619_s0 = inlined_call_operand.vmem [shape: f32[8,128], index: 0, kind: input, shape index: {}]   ;;  %s620_s1 = inlined_call_operand.vmem [shape: f32[128,8], index: 1, kind: input, shape index: {}]   ;;  %s621_s4 = inlined_call_operand.vmem [shape: f32[32,1], index: 4, kind: input, shape index: {}]   ;;  %s622_s5 = inlined_call_operand.vmem [shape: f32[32,1], index: 5, kind: input, shape index: {}]   ;;  %s623_s3 = inlined_call_operand.vmem [shape: f32[32,128], index: 3, kind: input, shape index: {}]   ;;  %s624_s6 = inlined_call_operand.<no memory space> [shape: f32[1], index: 6, kind: input, shape index: {}]   ;;  %s625_s7 = inlined_call_operand.vmem [shape: f32[1,128], index: 7, kind: output, shape index: {}]  }
   0x1   :  { %412 = vset.pattern.permute.xlu1 %v414_v0  ;;  %411 = vset.pattern.permute.xlu0 %v414_v0  ;;  %v59_v1 = vld [vmem:[%s618_s2 + $0x78] sm:$0xff]  ;;  %v57_v2 = vld [vmem:[%s618_s2 + $0x68] sm:$0xff]  ;;  %v43_v3 = vld [vmem:[%s619_s0] sm:$0xff] }
   0x2   :  { %137 = vperm.xlu0 %411, %v59_v1   ;;  %127 = vperm.xlu1 %412, %v57_v2   ;;  %v27_v4 = vld [vmem:[%s620_s1] sm:$0xff]  ;;  %v33_v5 = vld [vmem:[%s620_s1 + $0x30] sm:$0xff]  ;;  %v55_v7 = vld [vmem:[%s618_s2 + $0x58] sm:$0xff] }
   0x3   :  { %v39_v6 = vld [vmem:[%s620_s1 + $0x60] sm:$0xff]  ;;  %204 = vmatpush.msra.mxu0 %v43_v3  ;;  %392 = vmatpush.msra.mxu2 %v43_v3  ;;  %v58_v8 = vld [vmem:[%s618_s2 + $0x70] sm:$0xff]  ;;  %v28_v10 = vld [vmem:[%s620_s1 + $0x8] sm:$0xff] }
   0x4   :  { %393 = vmatpush.msra.mxu3 %v43_v3  ;;  %376 = vmatmul.msk.f32.vlgmr.msra.gmra.mxu0 %vm140_vm0, %v27_v4  ;;  %v56_v9 = vld [vmem:[%s618_s2 + $0x60] sm:$0xff]  ;;  %v34_v11 = vld [vmem:[%s620_s1 + $0x38] sm:$0xff]  ;;  %v40_v12 = vld [vmem:[%s620_s1 + $0x68] sm:$0xff] }
   0x5   :  { %382 = vmatmul.msk.f32.vlgmr.msra.gmra.mxu2 %vm140_vm0, %v33_v5  ;;  %388 = vmatmul.msk.f32.vlgmr.msra.gmra.mxu3 %vm140_vm0, %v39_v6  ;;  %v54_v13 = vld [vmem:[%s618_s2 + $0x50] sm:$0xff]  ;;  %v53_v14 = vld [vmem:[%s618_s2 + $0x48] sm:$0xff]  ;;  %v52_v15 = vld [vmem:[%s618_s2 + $0x40] sm:$0xff] }
   0x6   :  { %413 = vset.pattern.permute.xlu2 %v414_v0  ;;  %v29_v16 = vld [vmem:[%s620_s1 + $0x10] sm:$0xff]  ;;  %v35_v17 = vld [vmem:[%s620_s1 + $0x40] sm:$0xff]  ;;  %v51_v19 = vld [vmem:[%s618_s2 + $0x38] sm:$0xff] }
   0x7   :  { %117 = vperm.xlu2 %413, %v55_v7   ;;  %v41_v18 = vld [vmem:[%s620_s1 + $0x70] sm:$0xff]  ;;  %v49_v21 = vld [vmem:[%s618_s2 + $0x28] sm:$0xff]  ;;  %v30_v22 = vld [vmem:[%s620_s1 + $0x18] sm:$0xff] }
   0x8   :  { %v50_v20 = vld [vmem:[%s618_s2 + $0x30] sm:$0xff]  ;;  %v36_v23 = vld [vmem:[%s620_s1 + $0x48] sm:$0xff]  ;;  %v42_v24 = vld [vmem:[%s620_s1 + $0x78] sm:$0xff] }
   0x9   :  { %v48_v25 = vld [vmem:[%s618_s2 + $0x20] sm:$0xff]  ;;  %v47_v26 = vld [vmem:[%s618_s2 + $0x18] sm:$0xff]  ;;  %v46_v27 = vld [vmem:[%s618_s2 + $0x10] sm:$0xff] }
   0xa   :  { %132 = vperm.xlu0 %411, %v58_v8   ;;  %122 = vperm.xlu1 %412, %v56_v9   ;;  %v31_v28 = vld [vmem:[%s620_s1 + $0x20] sm:$0xff]  ;;  %v37_v29 = vld [vmem:[%s620_s1 + $0x50] sm:$0xff]  ;;  %v45_v30 = vld [vmem:[%s618_s2 + $0x8] sm:$0xff] }
   0xb   :  { %v274_v31 = vld [vmem:[%s621_s4] sm:$0xff]  ;;  %v32_v33 = vld [vmem:[%s620_s1 + $0x28] sm:$0xff]  ;;  %v38_v34 = vld [vmem:[%s620_s1 + $0x58] sm:$0xff] }
   0xc   :  { %377 = vmatmul.msk.f32.gmra.mxu0 %vm140_vm0, %v28_v10  ;;  %v44_v32 = vld [vmem:[%s618_s2] sm:$0xff]  ;;  %v275_v35 = vld [vmem:[%s621_s4 + $0x8] sm:$0xff]  ;;  %v277_v36 = vld [vmem:[%s621_s4 + $0x18] sm:$0xff] }
   0xd   :  { %383 = vmatmul.msk.f32.gmra.mxu2 %vm140_vm0, %v34_v11  ;;  %389 = vmatmul.msk.f32.gmra.mxu3 %vm140_vm0, %v40_v12  ;;  %v276_v37 = vld [vmem:[%s621_s4 + $0x10] sm:$0xff]  ;;  %v331_v38 = vld [vmem:[%s622_s5] sm:$0xff]  ;;  %v332_v40 = vld [vmem:[%s622_s5 + $0x8] sm:$0xff] }
   0xe   :  { %v333_v39 = vld [vmem:[%s622_s5 + $0x10] sm:$0xff]  ;;  %v334_v41 = vld [vmem:[%s622_s5 + $0x18] sm:$0xff] }
   0xf   :  { %112 = vperm.xlu2 %413, %v54_v13  }
  0x12   :  { %107 = vperm.xlu0 %411, %v53_v14   ;;  %102 = vperm.xlu1 %412, %v52_v15  }
  0x14   :  { %378 = vmatmul.msk.f32.gmra.mxu0 %vm140_vm0, %v29_v16 }
  0x15   :  { %384 = vmatmul.msk.f32.gmra.mxu2 %vm140_vm0, %v35_v17  ;;  %390 = vmatmul.msk.f32.gmra.mxu3 %vm140_vm0, %v41_v18 }
  0x17   :  { %97 = vperm.xlu2 %413, %v51_v19  }
  0x1a   :  { %92 = vperm.xlu0 %411, %v50_v20   ;;  %87 = vperm.xlu1 %412, %v49_v21  }
  0x1c   :  { %379 = vmatmul.msk.f32.gmra.mxu0 %vm140_vm0, %v30_v22 }
  0x1d   :  { %385 = vmatmul.msk.f32.gmra.mxu2 %vm140_vm0, %v36_v23  ;;  %391 = vmatmul.msk.f32.gmra.mxu3 %vm140_vm0, %v42_v24 }
  0x1f   :  { %82 = vperm.xlu2 %413, %v48_v25  }
  0x22   :  { %77 = vperm.xlu0 %411, %v47_v26   ;;  %72 = vperm.xlu1 %412, %v46_v27  }
  0x24   :  { %380 = vmatmul.msk.f32.gmra.mxu0 %vm140_vm0, %v31_v28 }
  0x25   :  { %386 = vmatmul.msk.f32.gmra.mxu2 %vm140_vm0, %v37_v29 }
  0x27   :  { %67 = vperm.xlu2 %413, %v45_v30  }
  0x2a   :  { %280 = vperm.xlu1 %412, %v274_v31   ;;  %62 = vperm.xlu0 %411, %v44_v32  }
  0x2c   :  { %381 = vmatmul.msk.f32.gmra.mxu0 %vm140_vm0, %v32_v33 }
  0x2d   :  { %387 = vmatmul.msk.f32.gmra.mxu2 %vm140_vm0, %v38_v34 }
  0x2f   :  { %285 = vperm.xlu2 %413, %v275_v35  }
  0x32   :  { %295 = vperm.xlu1 %412, %v277_v36   ;;  %290 = vperm.xlu0 %411, %v276_v37  }
  0x37   :  { %337 = vperm.xlu2 %413, %v331_v38  }
  0x3a   :  { %347 = vperm.xlu1 %412, %v333_v39   ;;  %342 = vperm.xlu0 %411, %v332_v40  }
  0x3f   :  { %352 = vperm.xlu2 %413, %v334_v41  }
  0x61   :  { %v118_v52 = vpop.permute.xlu2 %117 }
  0x69   :  { %v113_v60 = vpop.permute.xlu2 %112 }
  0x71   :  { %v98_v7 = vpop.permute.xlu2 %97 }
  0x74   :  { %v138_v45 = vpop.permute.xlu0 %137  ;;  %v128_v49 = vpop.permute.xlu1 %127 }
  0x79   :  { %v83_v18 = vpop.permute.xlu2 %82 }
  0x7c   :  { %v133_v53 = vpop.permute.xlu0 %132  ;;  %v123_v59 = vpop.permute.xlu1 %122 }
  0x81   :  { %v594_v42 = vpop.f32.mrf.mxu0  ;;  %v68_v34 = vpop.permute.xlu2 %67 }
  0x84   :  { %v108_v63 = vpop.permute.xlu0 %107  ;;  %v103_v6 = vpop.permute.xlu1 %102 }
  0x88   :  { %v224_v43 = vpop.f32.mrf.mxu2  ;;  %v242_v44 = vpop.f32.mrf.mxu3 }
  0x89   :  { %v596_v46 = vpop.f32.mrf.mxu0  ;;  %v243_v1 = vadd.f32 %v242_v44, %v123_v59  ;;  %v273_v44 = vld [vmem:[%s623_s3 + $0x18] sm:$0xff] }
  0x8a   :  { %v210_v36 = vadd.f32 %v596_v46, %v68_v34 }
  0x8b   :  { %v266_v5 = vmax.f32 %v243_v1, 0.0 }
  0x8c   :  { %v93_v8 = vpop.permute.xlu0 %92  ;;  %v88_v17 = vpop.permute.xlu1 %87  ;;  %v255_v40 = vmax.f32 %v210_v36, 0.0 }
  0x8d   :  { %v225_v23 = vadd.f32 %v224_v43, %v93_v8  ;;  %v270_v43 = vld [vmem:[%s623_s3] sm:$0xff] }
  0x8f   :  { %v260_v27 = vmax.f32 %v225_v23, 0.0 }
  0x90   :  { %v227_v47 = vpop.f32.mrf.mxu2  ;;  %v245_v48 = vpop.f32.mrf.mxu3 }
  0x91   :  { %v212_v54 = vpop.f32.mrf.mxu0  ;;  %v246_v61 = vadd.f32 %v245_v48, %v128_v49  ;;  %v228_v19 = vadd.f32 %v227_v47, %v98_v7  ;;  %v286_v48 = vpop.permute.xlu2 %285 }
  0x93   :  { %v267_v3 = vmax.f32 %v246_v61, 0.0  ;;  %v261_v25 = vmax.f32 %v228_v19, 0.0 }
  0x94   :  { %v78_v21 = vpop.permute.xlu0 %77  ;;  %v73_v31 = vpop.permute.xlu1 %72 }
  0x95   :  { %v213_v32 = vadd.f32 %v212_v54, %v73_v31 }
  0x97   :  { %v256_v38 = vmax.f32 %v213_v32, 0.0 }
  0x98   :  { %v230_v50 = vpop.f32.mrf.mxu2  ;;  %v248_v51 = vpop.f32.mrf.mxu3 }
  0x99   :  { %v249_v57 = vadd.f32 %v248_v51, %v133_v53  ;;  %v215_v0 = vpop.f32.mrf.mxu0  ;;  %v231_v15 = vadd.f32 %v230_v50, %v103_v6  ;;  %v338_v54 = vpop.permute.xlu2 %337 }
  0x9a   :  { %v216_v29 = vadd.f32 %v215_v0, %v78_v21 }
  0x9b   :  { %v268_v2 = vmax.f32 %v249_v57, 0.0  ;;  %v262_v24 = vmax.f32 %v231_v15, 0.0 }
  0x9c   :  { %v63_v35 = vpop.permute.xlu0 %62  ;;  %v257_v37 = vmax.f32 %v216_v29, 0.0  ;;  %v281_v46 = vpop.permute.xlu1 %280 }
  0x9d   :  { %v207_v39 = vadd.f32 %v594_v42, %v63_v35  ;;  %v271_v42 = vld [vmem:[%s623_s3 + $0x8] sm:$0xff] }
  0x9f   :  { %v254_v41 = vmax.f32 %v207_v39, 0.0 }
  0xa0   :  { %v233_v55 = vpop.f32.mrf.mxu2  ;;  %v251_v56 = vpop.f32.mrf.mxu3 }
  0xa1   :  { %v252_v58 = vadd.f32 %v251_v56, %v138_v45  ;;  %v218_v9 = vpop.f32.mrf.mxu0  ;;  %v234_v13 = vadd.f32 %v233_v55, %v108_v63  ;;  %v272_v45 = vld [vmem:[%s623_s3 + $0x10] sm:$0xff] }
  0xa2   :  { %v219_v28 = vadd.f32 %v218_v9, %v83_v18 }
  0xa3   :  { %v269_v62 = vmax.f32 %v252_v58, 0.0  ;;  %v263_v20 = vmax.f32 %v234_v13, 0.0 }
  0xa4   :  { %v258_v33 = vmax.f32 %v219_v28, 0.0  ;;  %v291_v49 = vpop.permute.xlu0 %290 }
  0xa5   :  { %298 = vmatpush.msra.mxu1 %v269_v62  ;;  %394 = vmatpush.msrb.mxu3 %v269_v62 }
  0xa7   :  { %299 = vmatpush.msra.mxu1 %v268_v2  ;;  %395 = vmatpush.msrb.mxu3 %v268_v2 }
  0xa8   :  { %v236_v4 = vpop.f32.mrf.mxu2 }
  0xa9   :  { %300 = vmatpush.msra.mxu1 %v267_v3  ;;  %396 = vmatpush.msrb.mxu3 %v267_v3  ;;  %v237_v11 = vadd.f32 %v236_v4, %v113_v60  ;;  %v221_v22 = vpop.f32.mrf.mxu0 }
  0xaa   :  { %v222_v26 = vadd.f32 %v221_v22, %v88_v17 }
  0xab   :  { %301 = vmatpush.msra.mxu1 %v266_v5  ;;  %397 = vmatpush.msrb.mxu3 %v266_v5  ;;  %v264_v16 = vmax.f32 %v237_v11, 0.0  ;;  %v353_v5 = vpop.permute.xlu2 %352 }
  0xac   :  { %v259_v30 = vmax.f32 %v222_v26, 0.0  ;;  %v343_v59 = vpop.permute.xlu0 %342 }
  0xb0   :  { %v239_v10 = vpop.f32.mrf.mxu2 }
  0xb1   :  { %v240_v12 = vadd.f32 %v239_v10, %v118_v52  ;;  %v296_v52 = vpop.permute.xlu1 %295 }
  0xb3   :  { %v265_v14 = vmax.f32 %v240_v12, 0.0 }
  0xb5   :  { %302 = vmatpush.msra.mxu1 %v265_v14  ;;  %398 = vmatpush.msrb.mxu3 %v265_v14  ;;  %v369_v14 = vstv %s624_s6 }
  0xb7   :  { %303 = vmatpush.msra.mxu1 %v264_v16  ;;  %399 = vmatpush.msrb.mxu3 %v264_v16 }
  0xb9   :  { %304 = vmatpush.msra.mxu1 %v263_v20  ;;  %400 = vmatpush.msrb.mxu3 %v263_v20  ;;  %v348_v2 = vpop.permute.xlu1 %347 }
  0xbb   :  { %305 = vmatpush.msra.mxu1 %v262_v24  ;;  %401 = vmatpush.msrb.mxu3 %v262_v24 }
  0xbd   :  { %306 = vmatpush.msra.mxu1 %v261_v25  ;;  %402 = vmatpush.msrb.mxu3 %v261_v25 }
  0xbf   :  { %307 = vmatpush.msra.mxu1 %v260_v27  ;;  %403 = vmatpush.msrb.mxu3 %v260_v27 }
  0xc1   :  { %308 = vmatpush.msra.mxu1 %v259_v30  ;;  %404 = vmatpush.msrb.mxu3 %v259_v30 }
  0xc3   :  { %309 = vmatpush.msra.mxu1 %v258_v33  ;;  %405 = vmatpush.msrb.mxu3 %v258_v33 }
  0xc5   :  { %310 = vmatpush.msra.mxu1 %v257_v37  ;;  %406 = vmatpush.msrb.mxu3 %v257_v37 }
  0xc7   :  { %311 = vmatpush.msra.mxu1 %v256_v38  ;;  %407 = vmatpush.msrb.mxu3 %v256_v38 }
  0xc9   :  { %312 = vmatpush.msra.mxu1 %v255_v40  ;;  %408 = vmatpush.msrb.mxu3 %v255_v40 }
  0xcb   :  { %313 = vmatpush.msra.mxu1 %v254_v41  ;;  %409 = vmatpush.msrb.mxu3 %v254_v41 }
  0xcc   :  { %314 = vmatmul.f32.vlgmr.msra.gmra.mxu1 %v270_v43  ;;  %323 = vmatmul.f32.vlgmr.msrb.gmra.mxu3 %v273_v44 }
  0xd4   :  { %317 = vmatmul.f32.gmra.mxu1 %v271_v42 }
  0xdc   :  { %320 = vmatmul.f32.gmra.mxu1 %v272_v45 }
 0x149   :  { %v315_v47 = vpop.f32.mrf.mxu1 }
 0x14a   :  { %v316_v53 = vadd.f32 %v315_v47, %v281_v46 }
 0x14c   :  { %v327_v57 = vmax.f32 %v316_v53, 0.0 }
 0x14e   :  { %v355_v63 = vmul.f32 %v338_v54, %v327_v57 }
 0x14f   :  { %v324_v55 = vpop.f32.mrf.mxu3 }
 0x150   :  { %v325_v58 = vadd.f32 %v324_v55, %v296_v52 }
 0x151   :  { %v318_v50 = vpop.f32.mrf.mxu1 }
 0x152   :  { %v319_v51 = vadd.f32 %v318_v50, %v286_v48  ;;  %v330_v0 = vmax.f32 %v325_v58, 0.0 }
 0x154   :  { %v328_v56 = vmax.f32 %v319_v51, 0.0  ;;  %v358_v6 = vmul.f32 %v353_v5, %v330_v0 }
 0x156   :  { %v356_v61 = vmul.f32 %v343_v59, %v328_v56 }
 0x158   :  { %v359_v3 = vadd.f32 %v356_v61, %v355_v63 }
 0x159   :  { %v321_v60 = vpop.f32.mrf.mxu1 }
 0x15a   :  { %v322_v62 = vadd.f32 %v321_v60, %v291_v49 }
 0x15c   :  { %v329_v1 = vmax.f32 %v322_v62, 0.0 }
 0x15e   :  { %v357_v4 = vmul.f32 %v348_v2, %v329_v1 }
 0x160   :  { %v360_v7 = vadd.f32 %v359_v3, %v357_v4 }
 0x162   :  { %v361_v8 = vadd.f32 %v360_v7, %v358_v6 }
 0x164   :  { %v362_v9 = vrot.slane %v361_v8, 4 }
 0x166   :  { %v363_v10 = vadd.f32 %v362_v9, %v361_v8 }
 0x168   :  { %v364_v11 = vrot.slane %v363_v10, 2 }
 0x16a   :  { %v365_v12 = vadd.f32 %v364_v11, %v363_v10 }
 0x16c   :  { %v366_v13 = vrot.slane %v365_v12, 1 }
 0x16e   :  { %v367_v15 = vadd.f32 %v366_v13, %v365_v12 }
 0x170   :  { %v370_v16 = vadd.f32 %v369_v14, %v367_v15 }
 0x172   :  { %371 = vst [vmem:[%s625_s7] sm:$0x1] %v370_v16 }

</bundles_post_ra>
